<compile_context>
chip_gen: v7x
topology: tpu7x:2x2x1
jax: 0.10.0
libtpu: 0.0.40
codegen_flags: <defaults>
</compile_context>

<pallas_src>
import functools
import math

import jax
import jax.numpy as jnp
from jax.experimental import pallas as pl
from jax.experimental.pallas import tpu as pltpu


_VMEM_LIMIT = 32 * 1024 * 1024  # explicit scoped-VMEM budget (fits v5e/v6e/v7x)


def _pick_row_tile(total, target):
    """Largest divisor of `total` that is a multiple of 8 and <= target, else `total`."""
    if total <= target:
        return total
    t = (target // 8) * 8
    while t >= 8:
        if total % t == 0:
            return t
        t -= 8
    return total


def _pick_lane_tile(total, target):
    """Largest divisor of `total` that is a multiple of 128 and <= target, else `total`."""
    if total <= target or total % 128 != 0:
        return total
    t = (target // 128) * 128
    while t >= 128:
        if total % t == 0:
            return t
        t -= 128
    return total


# --------------------------------------------------------------------------------------
# Kernel 1: graph aggregation   ax2d = adj @ x2d      (x2d laid out as (N, B*C))
# Tiled over adj output rows (parallel) and neighbour/K tiles (arbitrary, f32 accumulator).
# --------------------------------------------------------------------------------------
def aggregate_kernel(adj_ref, x_ref, ax_ref, acc_ref):
    k = pl.program_id(1)

    @pl.when(k == 0)
    def _():
        acc_ref[...] = jnp.zeros_like(acc_ref)

    acc_ref[...] += jnp.dot(adj_ref[...], x_ref[...],
                            preferred_element_type=jnp.float32)

    @pl.when(k == pl.num_programs(1) - 1)
    def _():
        ax_ref[...] = acc_ref[...].astype(ax_ref.dtype)


# --------------------------------------------------------------------------------------
# Kernel 2: feature transform  lin = ax @ W   (+ per-channel BN sum / sum-of-squares)
# Grid = (channel tiles [parallel], row tiles [arbitrary]); stats block is resident
# across the row axis -> correct BN statistics under row tiling.
# No bias add: it is absorbed by the BN mean subtraction (no-op on the forward output).
# --------------------------------------------------------------------------------------
def linear_stats_kernel(ax_ref, w_ref, lin_ref, stats_ref):
    r = pl.program_id(1)

    lin = jnp.dot(ax_ref[...], w_ref[...], preferred_element_type=jnp.float32)
    lin_ref[...] = lin

    @pl.when(r == 0)
    def _():
        stats_ref[...] = jnp.zeros_like(stats_ref)

    stats_ref[...] += jnp.concatenate(
        [jnp.sum(lin, axis=0, keepdims=True),
         jnp.sum(lin * lin, axis=0, keepdims=True)],
        axis=0,
    )


# --------------------------------------------------------------------------------------
# Kernel 3: BatchNorm1d (training-mode, biased variance, eps=1e-5) + affine + ReLU.
# Grid = (channel tiles, row tiles), fully parallel; lane-dense f32 stores.
# --------------------------------------------------------------------------------------
def bn_relu_kernel(lin_ref, stats_ref, gb_ref, out_ref, *, inv_m):
    stats = stats_ref[...]                       # (2, TH): [sum; sum of squares]
    mean = stats[0:1, :] * inv_m
    ex2 = stats[1:2, :] * inv_m
    var = ex2 - mean * mean                      # single-pass variance (f32)
    scale = jax.lax.rsqrt(var + 1e-5) * gb_ref[0:1, :]   # gamma
    shift = gb_ref[1:2, :] - mean * scale                 # beta - mean*scale
    out_ref[...] = jnp.maximum(lin_ref[...] * scale + shift, 0.0)


@jax.jit
def gcn_forward(x, weight, adj, bias, gamma, beta):
    # bias is intentionally unused: training-mode BN removes any per-channel constant.
    del bias
    B, N, C = x.shape
    nhid = weight.shape[1]
    M = B * N
    BC = B * C

    # Channel tile: 256 for v6e/v7x-sized hidden dims, 128 otherwise (v5e / toy sizes).
    TH = 256 if nhid >= 256 else 128
    H_pad = ((nhid + TH - 1) // TH) * TH

    # Parameter packing (channel dim zero-padded -> lane-dense output tiles).
    w_p = jnp.zeros((C, H_pad), jnp.float32).at[:, :nhid].set(weight).astype(jnp.bfloat16)
    gb = jnp.zeros((2, H_pad), jnp.float32)
    gb = gb.at[0, :nhid].set(gamma).at[1, :nhid].set(beta)

    # Layout plumbing: lane-dense aggregation RHS, x2d[n, b*C + c] = x[b, n, c].
    x2d = x.transpose(1, 0, 2).reshape(N, BC).astype(jnp.bfloat16)
    adj_bf = adj.astype(jnp.bfloat16)

    # ------------------------- kernel 1: ax2d = adj @ x2d -------------------------
    TN = _pick_row_tile(N, 256)      # adj output-row tile
    TK = _pick_lane_tile(N, 512)     # neighbour (contraction) tile
    ax2d = pl.pallas_call(
        aggregate_kernel,
        out_shape=jax.ShapeDtypeStruct((N, BC), jnp.bfloat16),
        grid_spec=pltpu.PrefetchScalarGridSpec(
            num_scalar_prefetch=0,
            grid=(N // TN, N // TK),
            in_specs=[
                pl.BlockSpec((TN, TK), lambda i, k: (i, k)),     # adj tile
                pl.BlockSpec((TK, BC), lambda i, k: (k, 0)),     # x2d K-slab
            ],
            out_specs=pl.BlockSpec((TN, BC), lambda i, k: (i, 0)),
            scratch_shapes=[pltpu.VMEM((TN, BC), jnp.float32)],
        ),
        compiler_params=pltpu.CompilerParams(
            dimension_semantics=("parallel", "arbitrary"),
            vmem_limit_bytes=_VMEM_LIMIT,
        ),
    )(adj_bf, x2d)

    # Layout plumbing: (N, B*C) -> (B*N, C) in (batch, node) row order.
    ax_flat = ax2d.reshape(N, B, C).transpose(1, 0, 2).reshape(M, C)

    # ---------------- kernel 2: lin = ax @ W  +  BN sum / sum-of-squares ----------------
    TM = _pick_row_tile(M, 512)
    n_ch = H_pad // TH
    n_row = M // TM
    lin, stats = pl.pallas_call(
        linear_stats_kernel,
        out_shape=(
            jax.ShapeDtypeStruct((M, H_pad), jnp.float32),
            jax.ShapeDtypeStruct((2, H_pad), jnp.float32),
        ),
        grid_spec=pltpu.PrefetchScalarGridSpec(
            num_scalar_prefetch=0,
            grid=(n_ch, n_row),
            in_specs=[
                pl.BlockSpec((TM, C), lambda j, r: (r, 0)),      # ax row tile
                pl.BlockSpec((C, TH), lambda j, r: (0, j)),      # W channel tile
            ],
            out_specs=(
                pl.BlockSpec((TM, TH), lambda j, r: (r, j)),     # lin tile
                pl.BlockSpec((2, TH), lambda j, r: (0, j)),      # stats: resident over rows
            ),
        ),
        compiler_params=pltpu.CompilerParams(
            dimension_semantics=("parallel", "arbitrary"),
            vmem_limit_bytes=_VMEM_LIMIT,
        ),
    )(ax_flat, w_p)

    # -------------------- kernel 3: BatchNorm (training) + ReLU --------------------
    out2d = pl.pallas_call(
        functools.partial(bn_relu_kernel, inv_m=1.0 / M),
        out_shape=jax.ShapeDtypeStruct((M, H_pad), jnp.float32),
        grid_spec=pltpu.PrefetchScalarGridSpec(
            num_scalar_prefetch=0,
            grid=(n_ch, n_row),
            in_specs=[
                pl.BlockSpec((TM, TH), lambda j, r: (r, j)),     # lin tile
                pl.BlockSpec((2, TH), lambda j, r: (0, j)),      # stats tile
                pl.BlockSpec((2, TH), lambda j, r: (0, j)),      # gamma/beta tile
            ],
            out_specs=pl.BlockSpec((TM, TH), lambda j, r: (r, j)),
        ),
        compiler_params=pltpu.CompilerParams(
            dimension_semantics=("parallel", "parallel"),
            vmem_limit_bytes=_VMEM_LIMIT,
        ),
    )(lin, stats, gb)

    out = out2d.reshape(B, N, H_pad)[:, :, :nhid]
    return out, adj


def reference_forward_f32(x, weight, adj, bias, gamma, beta):
    # Pure-f32 reference in the original (torch) operation order.
    support = jnp.einsum("bnc,ch->bnh", x, weight)
    out = jnp.einsum("nm,bmh->bnh", adj, support) + bias[None, None, :]
    mean = jnp.mean(out, axis=(0, 1), keepdims=True)
    var = jnp.mean((out - mean) ** 2, axis=(0, 1), keepdims=True)
    y = (out - mean) * jax.lax.rsqrt(var + 1e-5) * gamma[None, None, :] + beta[None, None, :]
    return jnp.maximum(y, 0.0), adj


def reference_forward_mixed(x, weight, adj, bias, gamma, beta):
    # Reference with the same mixed-precision contract as the kernels
    # (bf16 matmul inputs, f32 accumulation, bf16 ax, f32 BN/ReLU).  The bias is kept
    # here (module semantics) — training-mode BN absorbs it, so outputs must match.
    xb = x.astype(jnp.bfloat16)
    ab = adj.astype(jnp.bfloat16)
    wb = weight.astype(jnp.bfloat16)
    ax = jnp.einsum("nm,bmc->bnc", ab, xb, preferred_element_type=jnp.float32)
    out = jnp.einsum("bnc,ch->bnh", ax.astype(jnp.bfloat16), wb,
                     preferred_element_type=jnp.float32) + bias[None, None, :]
    mean = jnp.mean(out, axis=(0, 1), keepdims=True)
    var = jnp.mean(out * out, axis=(0, 1), keepdims=True) - mean * mean
    y = (out - mean) * jax.lax.rsqrt(var + 1e-5) * gamma[None, None, :] + beta[None, None, :]
    return jnp.maximum(y, 0.0)


if __name__ == "__main__":
    B, N = 2, 16
    nfeat, nhid = 8, 32

    key = jax.random.PRNGKey(0)
    k_x, k_w, k_b, k_adj = jax.random.split(key, 4)

    # Input features (B, N, nfeat)
    x = jax.random.normal(k_x, (B, N, nfeat), dtype=jnp.float32)

    # GraphConvolution parameters, init like torch: uniform(-stdv, stdv)
    stdv = 1.0 / math.sqrt(nhid)
    weight = jax.random.uniform(
        k_w, (nfeat, nhid), dtype=jnp.float32, minval=-stdv, maxval=stdv
    )
    bias = jax.random.uniform(
        k_b, (nhid,), dtype=jnp.float32, minval=-stdv, maxval=stdv
    )

    # TODO(synk): the original module loads the adjacency from np.load(mat_path);
    # here a deterministic symmetric row-normalized random graph with self-loops is built.
    a_raw = (jax.random.uniform(k_adj, (N, N)) > 0.5).astype(jnp.float32)
    a_sym = jnp.maximum(a_raw, a_raw.T) + jnp.eye(N, dtype=jnp.float32)
    deg_inv = 1.0 / jnp.sum(a_sym, axis=1, keepdims=True)
    adj = (a_sym * deg_inv).astype(jnp.float32)

    # BatchNorm1d parameters (default init: gamma=1, beta=0)
    gamma = jnp.ones((nhid,), dtype=jnp.float32)
    beta = jnp.zeros((nhid,), dtype=jnp.float32)

    out, adj_out = jax.block_until_ready(
        gcn_forward(x, weight, adj, bias, gamma, beta)
    )

    assert out.shape == (B, N, nhid)
    assert out.dtype == jnp.float32
    assert jnp.allclose(adj_out, adj)

    # Tight check against a reference with the same mixed-precision contract.
    ref_mixed = reference_forward_mixed(x, weight, adj, bias, gamma, beta)
    assert jnp.allclose(out, ref_mixed, atol=1e-2, rtol=1e-2)

    # Loose sanity check against the pure-f32 (original torch-order) reference.
    ref_f32, _ = reference_forward_f32(x, weight, adj, bias, gamma, beta)
    assert jnp.allclose(out, ref_f32, atol=1e-1, rtol=1e-1)

    print("KERNEL_OK")
</pallas_src>

<mosaic_0001>
module attributes {stable_mosaic.version = 11 : i64} {
  func.func @aggregate_kernel(%arg0: i32, %arg1: i32, %arg2: memref<16x16xbf16, #tpu.memory_space<vmem>>, %arg3: memref<16x16xbf16, #tpu.memory_space<vmem>>, %arg4: memref<16x16xbf16, #tpu.memory_space<vmem>>, %arg5: memref<16x16xf32, #tpu.memory_space<vmem>>) attributes {dimension_semantics = [#tpu.dimension_semantics<parallel>, #tpu.dimension_semantics<arbitrary>], iteration_bounds = array<i64: 1, 1>, scalar_prefetch = 0 : i64, scratch_operands = 1 : i64, tpu.core_type = #tpu.core_type<tc>, window_params = [{transform_indices = @transform_0, window_bounds = array<i64: 16, 16>}, {transform_indices = @transform_1, window_bounds = array<i64: 16, 16>}, {transform_indices = @transform_2, window_bounds = array<i64: 16, 16>}]} {
    %c0_i32 = arith.constant 0 : i32
    %0 = arith.cmpi eq, %arg1, %c0_i32 : i32
    %1 = arith.extui %0 : i1 to i32
    %c0_i32_0 = arith.constant 0 : i32
    %2 = arith.cmpi ne, %1, %c0_i32_0 : i32
    scf.if %2 {
      %cst_10 = arith.constant 0.000000e+00 : f32
      %12 = vector.broadcast %cst_10 : f32 to vector<16x16xf32>
      %c0_11 = arith.constant 0 : index
      %c0_12 = arith.constant 0 : index
      %13 = vector.load %arg5[%c0_11, %c0_12] : memref<16x16xf32, #tpu.memory_space<vmem>>, vector<16x16xf32>
      tpu.vector_store %arg5[%c0_11, %c0_12], %12 {strides = array<i32>} : memref<16x16xf32, #tpu.memory_space<vmem>>, vector<16x16xf32>,
    } else {
    }
    %c0 = arith.constant 0 : index
    %c0_1 = arith.constant 0 : index
    %3 = vector.load %arg5[%c0, %c0_1] : memref<16x16xf32, #tpu.memory_space<vmem>>, vector<16x16xf32>
    %c0_2 = arith.constant 0 : index
    %c0_3 = arith.constant 0 : index
    %4 = vector.load %arg2[%c0_2, %c0_3] : memref<16x16xbf16, #tpu.memory_space<vmem>>, vector<16x16xbf16>
    %c0_4 = arith.constant 0 : index
    %c0_5 = arith.constant 0 : index
    %5 = vector.load %arg3[%c0_4, %c0_5] : memref<16x16xbf16, #tpu.memory_space<vmem>>, vector<16x16xbf16>
    %cst = arith.constant dense<0.000000e+00> : vector<16x16xf32>
    %6 = tpu.matmul %4, %5, %cst {dimension_numbers = #tpu.dot_dimension_numbers<[1], [0], [0], [1], [0, 0, 1, 1], [], []>} : vector<16x16xbf16>, vector<16x16xbf16>, vector<16x16xf32> -> vector<16x16xf32>
    %7 = arith.addf %3, %6 : vector<16x16xf32>
    %c0_6 = arith.constant 0 : index
    %c0_7 = arith.constant 0 : index
    %8 = vector.load %arg5[%c0_6, %c0_7] : memref<16x16xf32, #tpu.memory_space<vmem>>, vector<16x16xf32>
    tpu.vector_store %arg5[%c0_6, %c0_7], %7 {strides = array<i32>} : memref<16x16xf32, #tpu.memory_space<vmem>>, vector<16x16xf32>,
    %c0_i32_8 = arith.constant 0 : i32
    %9 = arith.cmpi eq, %arg1, %c0_i32_8 : i32
    %10 = arith.extui %9 : i1 to i32
    %c0_i32_9 = arith.constant 0 : i32
    %11 = arith.cmpi ne, %10, %c0_i32_9 : i32
    scf.if %11 {
      %c0_10 = arith.constant 0 : index
      %c0_11 = arith.constant 0 : index
      %12 = vector.load %arg5[%c0_10, %c0_11] : memref<16x16xf32, #tpu.memory_space<vmem>>, vector<16x16xf32>
      %13 = arith.truncf %12 : vector<16x16xf32> to vector<16x16xbf16>
      %c0_12 = arith.constant 0 : index
      %c0_13 = arith.constant 0 : index
      %14 = vector.load %arg4[%c0_12, %c0_13] : memref<16x16xbf16, #tpu.memory_space<vmem>>, vector<16x16xbf16>
      tpu.vector_store %arg4[%c0_12, %c0_13], %13 {strides = array<i32>} : memref<16x16xbf16, #tpu.memory_space<vmem>>, vector<16x16xbf16>,
    } else {
    }
    return
  }
  func.func @transform_0(%arg0: i32, %arg1: i32) -> (i32, i32) {
    %c0_i32 = arith.constant 0 : i32
    return %arg0, %arg1 : i32, i32
  }
  func.func @transform_1(%arg0: i32, %arg1: i32) -> (i32, i32) {
    %c0_i32 = arith.constant 0 : i32
    %c0_i32_0 = arith.constant 0 : i32
    return %arg1, %c0_i32 : i32, i32
  }
  func.func @transform_2(%arg0: i32, %arg1: i32) -> (i32, i32) {
    %c0_i32 = arith.constant 0 : i32
    %c0_i32_0 = arith.constant 0 : i32
    return %arg0, %c0_i32 : i32, i32
  }
}

module attributes {stable_mosaic.version = 11 : i64} {
  func.func @linear_stats_kernel(%arg0: i32, %arg1: i32, %arg2: memref<32x8xbf16, #tpu.memory_space<vmem>>, %arg3: memref<8x128xbf16, #tpu.memory_space<vmem>>, %arg4: memref<32x128xf32, #tpu.memory_space<vmem>>, %arg5: memref<2x128xf32, #tpu.memory_space<vmem>>) attributes {dimension_semantics = [#tpu.dimension_semantics<parallel>, #tpu.dimension_semantics<arbitrary>], iteration_bounds = array<i64: 1, 1>, scalar_prefetch = 0 : i64, scratch_operands = 0 : i64, tpu.core_type = #tpu.core_type<tc>, window_params = [{transform_indices = @transform_0, window_bounds = array<i64: 32, 8>}, {transform_indices = @transform_1, window_bounds = array<i64: 8, 128>}, {transform_indices = @transform_2, window_bounds = array<i64: 32, 128>}, {transform_indices = @transform_3, window_bounds = array<i64: 2, 128>}]} {
    %c0 = arith.constant 0 : index
    %c0_0 = arith.constant 0 : index
    %0 = vector.load %arg2[%c0, %c0_0] : memref<32x8xbf16, #tpu.memory_space<vmem>>, vector<32x8xbf16>
    %c0_1 = arith.constant 0 : index
    %c0_2 = arith.constant 0 : index
    %1 = vector.load %arg3[%c0_1, %c0_2] : memref<8x128xbf16, #tpu.memory_space<vmem>>, vector<8x128xbf16>
    %cst = arith.constant dense<0.000000e+00> : vector<32x128xf32>
    %2 = tpu.matmul %0, %1, %cst {dimension_numbers = #tpu.dot_dimension_numbers<[1], [0], [0], [1], [0, 0, 1, 1], [], []>} : vector<32x8xbf16>, vector<8x128xbf16>, vector<32x128xf32> -> vector<32x128xf32>
    %c0_3 = arith.constant 0 : index
    %c0_4 = arith.constant 0 : index
    %3 = vector.load %arg4[%c0_3, %c0_4] : memref<32x128xf32, #tpu.memory_space<vmem>>, vector<32x128xf32>
    tpu.vector_store %arg4[%c0_3, %c0_4], %2 {strides = array<i32>} : memref<32x128xf32, #tpu.memory_space<vmem>>, vector<32x128xf32>,
    %c0_i32 = arith.constant 0 : i32
    %4 = arith.cmpi eq, %arg1, %c0_i32 : i32
    %5 = arith.extui %4 : i1 to i32
    %c0_i32_5 = arith.constant 0 : i32
    %6 = arith.cmpi ne, %5, %c0_i32_5 : i32
    scf.if %6 {
      %cst_12 = arith.constant 0.000000e+00 : f32
      %16 = vector.broadcast %cst_12 : f32 to vector<2x128xf32>
      %c0_13 = arith.constant 0 : index
      %c0_14 = arith.constant 0 : index
      %17 = vector.load %arg5[%c0_13, %c0_14] : memref<2x128xf32, #tpu.memory_space<vmem>>, vector<2x128xf32>
      tpu.vector_store %arg5[%c0_13, %c0_14], %16 {strides = array<i32>} : memref<2x128xf32, #tpu.memory_space<vmem>>, vector<2x128xf32>,
    } else {
    }
    %c0_6 = arith.constant 0 : index
    %c0_7 = arith.constant 0 : index
    %7 = vector.load %arg5[%c0_6, %c0_7] : memref<2x128xf32, #tpu.memory_space<vmem>>, vector<2x128xf32>
    %cst_8 = arith.constant dense<0.000000e+00> : vector<128xf32>
    %8 = vector.multi_reduction <add>, %2, %cst_8 [0] : vector<32x128xf32> to vector<128xf32>
    %9 = vector.shape_cast %8 : vector<128xf32> to vector<1x128xf32>
    %10 = arith.mulf %2, %2 : vector<32x128xf32>
    %cst_9 = arith.constant dense<0.000000e+00> : vector<128xf32>
    %11 = vector.multi_reduction <add>, %10, %cst_9 [0] : vector<32x128xf32> to vector<128xf32>
    %12 = vector.shape_cast %11 : vector<128xf32> to vector<1x128xf32>
    %13 = tpu.concatenate %9, %12 in 0 : vector<1x128xf32>, vector<1x128xf32> -> vector<2x128xf32>
    %14 = arith.addf %7, %13 : vector<2x128xf32>
    %c0_10 = arith.constant 0 : index
    %c0_11 = arith.constant 0 : index
    %15 = vector.load %arg5[%c0_10, %c0_11] : memref<2x128xf32, #tpu.memory_space<vmem>>, vector<2x128xf32>
    tpu.vector_store %arg5[%c0_10, %c0_11], %14 {strides = array<i32>} : memref<2x128xf32, #tpu.memory_space<vmem>>, vector<2x128xf32>,
    return
  }
  func.func @transform_0(%arg0: i32, %arg1: i32) -> (i32, i32) {
    %c0_i32 = arith.constant 0 : i32
    %c0_i32_0 = arith.constant 0 : i32
    return %arg1, %c0_i32 : i32, i32
  }
  func.func @transform_1(%arg0: i32, %arg1: i32) -> (i32, i32) {
    %c0_i32 = arith.constant 0 : i32
    %c0_i32_0 = arith.constant 0 : i32
    return %c0_i32, %arg0 : i32, i32
  }
  func.func @transform_2(%arg0: i32, %arg1: i32) -> (i32, i32) {
    %c0_i32 = arith.constant 0 : i32
    return %arg1, %arg0 : i32, i32
  }
  func.func @transform_3(%arg0: i32, %arg1: i32) -> (i32, i32) {
    %c0_i32 = arith.constant 0 : i32
    %c0_i32_0 = arith.constant 0 : i32
    return %c0_i32, %arg0 : i32, i32
  }
}

module attributes {stable_mosaic.version = 11 : i64} {
  func.func @bn_relu_kernel(%arg0: i32, %arg1: i32, %arg2: memref<32x128xf32, #tpu.memory_space<vmem>>, %arg3: memref<2x128xf32, #tpu.memory_space<vmem>>, %arg4: memref<2x128xf32, #tpu.memory_space<vmem>>, %arg5: memref<32x128xf32, #tpu.memory_space<vmem>>) attributes {dimension_semantics = [#tpu.dimension_semantics<parallel>, #tpu.dimension_semantics<parallel>], iteration_bounds = array<i64: 1, 1>, scalar_prefetch = 0 : i64, scratch_operands = 0 : i64, tpu.core_type = #tpu.core_type<tc>, window_params = [{transform_indices = @transform_0, window_bounds = array<i64: 32, 128>}, {transform_indices = @transform_1, window_bounds = array<i64: 2, 128>}, {transform_indices = @transform_2, window_bounds = array<i64: 2, 128>}, {transform_indices = @transform_3, window_bounds = array<i64: 32, 128>}]} {
    %c0 = arith.constant 0 : index
    %c0_0 = arith.constant 0 : index
    %0 = vector.load %arg3[%c0, %c0_0] : memref<2x128xf32, #tpu.memory_space<vmem>>, vector<2x128xf32>
    %1 = vector.extract_strided_slice %0 {offsets = [0, 0], sizes = [1, 128], strides = [1, 1]} : vector<2x128xf32> to vector<1x128xf32>
    %cst = arith.constant 3.125000e-02 : f32
    %2 = vector.broadcast %cst : f32 to vector<1x128xf32>
    %3 = arith.mulf %1, %2 : vector<1x128xf32>
    %4 = vector.extract_strided_slice %0 {offsets = [1, 0], sizes = [1, 128], strides = [1, 1]} : vector<2x128xf32> to vector<1x128xf32>
    %cst_1 = arith.constant 3.125000e-02 : f32
    %5 = vector.broadcast %cst_1 : f32 to vector<1x128xf32>
    %6 = arith.mulf %4, %5 : vector<1x128xf32>
    %7 = arith.mulf %3, %3 : vector<1x128xf32>
    %8 = arith.subf %6, %7 : vector<1x128xf32>
    %cst_2 = arith.constant 9.99999974E-6 : f32
    %9 = vector.broadcast %cst_2 : f32 to vector<1x128xf32>
    %10 = arith.addf %8, %9 : vector<1x128xf32>
    %11 = math.rsqrt %10 : vector<1x128xf32>
    %c0_3 = arith.constant 0 : index
    %c0_4 = arith.constant 0 : index
    %12 = vector.load %arg4[%c0_3, %c0_4] : memref<2x128xf32, #tpu.memory_space<vmem>>, vector<1x128xf32>
    %13 = arith.mulf %11, %12 : vector<1x128xf32>
    %c1 = arith.constant 1 : index
    %c0_5 = arith.constant 0 : index
    %14 = vector.load %arg4[%c1, %c0_5] : memref<2x128xf32, #tpu.memory_space<vmem>>, vector<1x128xf32>
    %15 = arith.mulf %3, %13 : vector<1x128xf32>
    %16 = arith.subf %14, %15 : vector<1x128xf32>
    %c0_6 = arith.constant 0 : index
    %c0_7 = arith.constant 0 : index
    %17 = vector.load %arg2[%c0_6, %c0_7] : memref<32x128xf32, #tpu.memory_space<vmem>>, vector<32x128xf32>
    %18 = vector.broadcast %13 : vector<1x128xf32> to vector<32x128xf32>
    %19 = arith.mulf %17, %18 : vector<32x128xf32>
    %20 = vector.broadcast %16 : vector<1x128xf32> to vector<32x128xf32>
    %21 = arith.addf %19, %20 : vector<32x128xf32>
    %cst_8 = arith.constant 0.000000e+00 : f32
    %22 = vector.broadcast %cst_8 : f32 to vector<32x128xf32>
    %23 = arith.maximumf %21, %22 : vector<32x128xf32>
    %c0_9 = arith.constant 0 : index
    %c0_10 = arith.constant 0 : index
    %24 = vector.load %arg5[%c0_9, %c0_10] : memref<32x128xf32, #tpu.memory_space<vmem>>, vector<32x128xf32>
    tpu.vector_store %arg5[%c0_9, %c0_10], %23 {strides = array<i32>} : memref<32x128xf32, #tpu.memory_space<vmem>>, vector<32x128xf32>,
    return
  }
  func.func @transform_0(%arg0: i32, %arg1: i32) -> (i32, i32) {
    %c0_i32 = arith.constant 0 : i32
    return %arg1, %arg0 : i32, i32
  }
  func.func @transform_1(%arg0: i32, %arg1: i32) -> (i32, i32) {
    %c0_i32 = arith.constant 0 : i32
    %c0_i32_0 = arith.constant 0 : i32
    return %c0_i32, %arg0 : i32, i32
  }
  func.func @transform_2(%arg0: i32, %arg1: i32) -> (i32, i32) {
    %c0_i32 = arith.constant 0 : i32
    %c0_i32_0 = arith.constant 0 : i32
    return %c0_i32, %arg0 : i32, i32
  }
  func.func @transform_3(%arg0: i32, %arg1: i32) -> (i32, i32) {
    %c0_i32 = arith.constant 0 : i32
    return %arg1, %arg0 : i32, i32
  }
}

</mosaic_0001>

<bundles_post_ra>
// kernel: gcn_forward.4
= control target key start
LH: loop header
LB: loop body
LE: loop exit
PB: predicated region body
PF: predicated region fallthrough
CT: control target
= control target key end

     0   :  { %vm36_vm0 = vcmask 1043456   ;;  %vm29_vm1 = vcmask 64512   ;;  %v150_v4 = vmov 0.0   ;;  %vm121_vm2 = vcmask 1040384   ;;  %s201_s1 = inlined_call_operand.vmem [shape: bf16[8,128], index: 1, kind: input, shape index: {}]   ;;  %s202_s0 = inlined_call_operand.vmem [shape: bf16[32,8], index: 0, kind: input, shape index: {}]   ;;  %s203_s3 = inlined_call_operand.vmem [shape: f32[2,128], index: 3, kind: output, shape index: {1}]   ;;  %s204_s2 = inlined_call_operand.vmem [shape: f32[32,128], index: 2, kind: output, shape index: {0}]  }
   0x1   :  { %v18_v0 = vld [vmem:[%s201_s1] sm:$0xf]  ;;  %v149_v3 = vld [vmem:[%s202_s0 + $0x8] sm:$0xff]   ;;  %97 = vst [vmem:[%s203_s3] sm:$0x3] %v150_v4 }
   0x2   :  { %146 = vmatprep.subr.msk.bf16.mxu0 %vm36_vm0, %v18_v0  ;;  %v38_v1 = vsel %vm36_vm0, %v18_v0, 0  ;;  %v148_v2 = vld [vmem:[%s202_s0] sm:$0xff]  }
   0x3   :  { %141 = vmatpush3.bf16.msra.mxu0 %v38_v1  ;;  %142 = vmatprep.mubr.msk.bf16.mxu0 %vm29_vm1, %v148_v2 }
   0x6   :  { %143 = vmatmul.mubr.msk.bf16.vlgmr.msra.gmra.mrb[0].mxu0 %vm29_vm1, %v149_v3 }
   0x8   :  { %v98_v29 = vld [vmem:[%s203_s3] sm:$0x3] }
  0xd9   :  { %v144_v5 = vpop.f32.mrb[0].mxu0 }
  0xda   :  { %91 = vst [vmem:[%s204_s2 + $0x10] sm:$0xff] %v144_v5  ;;  %v74_v6 = vpop.f32.mrb[1].mxu0  ;;  %v110_v12 = vmul.f32 %v144_v5, %v144_v5 }
  0xdb   :  { %89 = vst [vmem:[%s204_s2] sm:$0xff] %v74_v6  ;;  %v145_v7 = vpop.f32.mrb[2].mxu0  ;;  %v108_v9 = vmul.f32 %v74_v6, %v74_v6 }
  0xdc   :  { %92 = vst [vmem:[%s204_s2 + $0x18] sm:$0xff] %v145_v7  ;;  %v77_v8 = vpop.f32.mrb[3].mxu0  ;;  %v111_v15 = vmul.f32 %v145_v7, %v145_v7 }
  0xdd   :  { %90 = vst [vmem:[%s204_s2 + $0x8] sm:$0xff] %v77_v8  ;;  %v99_v10 = vadd.f32 %v77_v8, %v74_v6  ;;  %v109_v11 = vmul.f32 %v77_v8, %v77_v8 }
  0xdf   :  { %v100_v13 = vadd.f32 %v144_v5, %v99_v10  ;;  %v112_v14 = vadd.f32 %v109_v11, %v108_v9 }
  0xe1   :  { %v101_v16 = vadd.f32 %v145_v7, %v100_v13  ;;  %v113_v17 = vadd.f32 %v112_v14, %v110_v12 }
  0xe3   :  { %v102_v18 = vrot.slane %v101_v16, 4  ;;  %v114_v19 = vadd.f32 %v113_v17, %v111_v15 }
  0xe5   :  { %v103_v20 = vadd.f32 %v102_v18, %v101_v16  ;;  %v115_v21 = vrot.slane %v114_v19, 4 }
  0xe7   :  { %v104_v22 = vrot.slane %v103_v20, 2  ;;  %v116_v23 = vadd.f32 %v115_v21, %v114_v19 }
  0xe9   :  { %v105_v24 = vadd.f32 %v104_v22, %v103_v20  ;;  %v117_v25 = vrot.slane %v116_v23, 2 }
  0xeb   :  { %v106_v26 = vrot.slane %v105_v24, 1  ;;  %v118_v27 = vadd.f32 %v117_v25, %v116_v23 }
  0xed   :  { %v119_v28 = vrot.slane %v118_v27, 1  ;;  %v107_v30 = vadd.f32 %v106_v26, %v105_v24 }
  0xef   :  { %v120_v31 = vadd.f32 %v119_v28, %v118_v27 }
  0xf1   :  { %v122_v32 = vsel %vm121_vm2, %v107_v30, %v120_v31 }
  0xf2   :  { %v123_v33 = vadd.f32 %v122_v32, %v98_v29 }
  0xf4   :  { %124 = vst [vmem:[%s203_s3] sm:$0x3] %v123_v33 }

// kernel: gcn_forward.3
= control target key start
LH: loop header
LB: loop body
LE: loop exit
PB: predicated region body
PF: predicated region fallthrough
CT: control target
= control target key end

     0   :  { %vm16_vm0 = vcmask 130048   ;;  %v124_v0 = vmov 0.0   ;;  %vm125_vm1 = vmmov 0   ;;  %vm98_vm2 = vcmask 125952   ;;  %s158_s1 = inlined_call_operand.vmem [shape: bf16[16,16], index: 1, kind: input, shape index: {}]   ;;  %s159_s0 = inlined_call_operand.vmem [shape: bf16[16,16], index: 0, kind: input, shape index: {}]   ;;  %s160_s2 = inlined_call_operand.vmem [shape: bf16[16,16], index: 2, kind: output, shape index: {}]  }
   0x1   :  { %114 = vmatprep.subr.bf16.mxu0 %v124_v0  ;;  %v122_v1 = vld [vmem:[%s158_s1] sm:$0xff]   ;;  %116 = vmatprep.mubr.msk.bf16.mxu0 %vm125_vm1, %v124_v0  ;;  %17 = vst.msk [vmem:[#allocation2] sm:$0xff] %vm16_vm0, %v124_v0  ;;  %18 = vst.msk [vmem:[#allocation2 + $0x8] sm:$0xff] %vm16_vm0, %v124_v0 }
   0x2   :  { %v123_v2 = vld [vmem:[%s159_s0] sm:$0xff]   ;;  %115 = vmatpush3.bf16.msra.mxu0 %v122_v1 }
   0x5   :  { %117 = vmatmul.mubr.msk.bf16.vlgmr.msra.gmra.mrb[0].mxu0 %vm16_vm0, %v123_v2 }
   0x8   :  { %v19_v3 = vld [vmem:[#allocation2] sm:$0xff]  ;;  %v20_v5 = vld [vmem:[#allocation2 + $0x8] sm:$0xff] }
  0xd8   :  { %v74_v4 = vpop.f32.mrb[0].mxu0 }
  0xd9   :  { %v81_v6 = vadd.f32 %v74_v4, %v19_v3  ;;  %v118_v7 = vpop.f32.mrb[1].mxu0 }
  0xda   :  { %v77_v8 = vpop.f32.mrb[2].mxu0 }
  0xdb   :  { %83 = vst.msk [vmem:[#allocation2] sm:$0xff] %vm16_vm0, %v81_v6  ;;  %v82_v9 = vadd.f32 %v77_v8, %v20_v5  ;;  %v119_v10 = vpop.f32.mrb[3].mxu0 }
  0xdd   :  { %84 = vst.msk [vmem:[#allocation2 + $0x8] sm:$0xff] %vm16_vm0, %v82_v9 }
  0xe2   :  { %v88_v11 = vld [vmem:[#allocation2] sm:$0xff] }
  0xe3   :  { %v110_v12 = vpack.c.bf16 %v88_v11, %v88_v11 }
  0xe4   :  { %v89_v13 = vld [vmem:[#allocation2 + $0x8] sm:$0xff] }
  0xe5   :  { %99 = vst.msk [vmem:[%s160_s2] sm:$0xf] %vm98_vm2, %v110_v12  ;;  %v111_v14 = vpack.c.bf16 %v89_v13, %v89_v13 }
  0xe7   :  { %100 = vst.msk [vmem:[%s160_s2 + $0x4] sm:$0xf] %vm98_vm2, %v111_v14 }

// kernel: gcn_forward.5
= control target key start
LH: loop header
LB: loop body
LE: loop exit
PB: predicated region body
PF: predicated region fallthrough
CT: control target
= control target key end

     0   :  { %s164_s0 = inlined_call_operand.vmem [shape: f32[32,128], index: 0, kind: input, shape index: {}]   ;;  %s165_s1 = inlined_call_operand.vmem [shape: f32[2,128], index: 1, kind: input, shape index: {}]   ;;  %s166_s2 = inlined_call_operand.vmem [shape: f32[2,128], index: 2, kind: input, shape index: {}]   ;;  %s167_s3 = inlined_call_operand.hbm [shape: f32[32,128], index: 3, kind: output, shape index: {}]  }
   0x1   :  { %v15_v0 = vld [vmem:[%s165_s1] sm:$0x3] }
   0x2   :  { %v16_v1 = vmul.f32 0.03125, %v15_v0 }
   0x3   :  { %8 = vsyncpa [#allocation3], 0  ;;  %v39_v6 = vlaneseq  ;;  %v24_v7 = vld [vmem:[%s166_s2] sm:$0x1]  ;;  %v29_v13 = vld [vmem:[%s166_s2 + $0x1] sm:$0x1] }
   0x4   :  { %v17_v2 = vmul.f32 %v16_v1, %v16_v1  ;;  %v26_v9 = vrot.slane %v24_v7, 7  ;;  %v35_v15 = vld [vmem:[%s164_s0] sm:$0xff]  ;;  %v36_v17 = vld [vmem:[%s164_s0 + $0x8] sm:$0xff]  ;;  %v37_v18 = vld [vmem:[%s164_s0 + $0x10] sm:$0xff]  ;;  %s108_s2 = smov [#allocation2]  }
   0x5   :  { %v40_v8 = vshrl.u32 %v39_v6, 7  ;;  %v38_v19 = vld [vmem:[%s164_s0 + $0x18] sm:$0xff]  ;;  %s68_s25 = sshll.u32 %s108_s2, 4  ;;  %s69_s25 = int_to_ptr.vmem [resolvable:$true] %s68_s25 }
   0x6   :  { %v19_v3 = vrot.slane %v17_v2, 7  ;;  %s84_s0 = scalar_lea.vmem %s69_s25, 512  ;;  %p89_p1 = scmp.lt.s32.totalorder %s69_s25, %s69_s25 }
   0x7   :  { %v41_v10 = vsub.s32 1, %v40_v8  ;;  %v49_v21 = vsub.s32 0, %v40_v8  ;;  %p85_p0 = scmp.ne.s32.totalorder %s69_s25, %s84_s0  ;;  %p90_p2 = scmp.lt.s32.totalorder %s84_s0, %s84_s0 }
   0x8   :  { %v21_v4 = vsub.f32 %v16_v1, %v19_v3 }
   0x9   :  { %p91_p3 = por %p90_p2, %p89_p1 }
   0xa   :  { %v22_v5 = vadd.f32 1e-05, %v21_v4 }
   0xb   :  { %p92_p4 = pnand %p91_p3, %p85_p0 }
   0xc   :  { %82 = vrsqrt.f32 %v22_v5 }
  0x16   :  { %v83_v11 = vpop.eup %82 }
  0x17   :  { %v28_v12 = vmul.f32 %v83_v11, %v26_v9 }
  0x19   :  { %v31_v14 = vrot.slane %v28_v12, 1  ;;  %v42_v16 = vrot.slane %v28_v12, %v41_v10 }
  0x1b   :  { %v33_v20 = vmul.f32 %v31_v14, %v16_v1  ;;  %v43_v22 = vmul.f32 %v42_v16, %v35_v15  ;;  %v44_v24 = vmul.f32 %v42_v16, %v36_v17  ;;  %v45_v25 = vmul.f32 %v42_v16, %v37_v18 }
  0x1c   :  { %v46_v26 = vmul.f32 %v42_v16, %v38_v19 }
  0x1d   :  { %v34_v23 = vsub.f32 %v29_v13, %v33_v20 }
  0x1f   :  { %v50_v27 = vrot.slane %v34_v23, %v49_v21 }
  0x21   :  { %v51_v28 = vadd.f32 %v50_v27, %v43_v22  ;;  %v52_v29 = vadd.f32 %v50_v27, %v44_v24  ;;  %v53_v30 = vadd.f32 %v50_v27, %v45_v25  ;;  %v54_v31 = vadd.f32 %v50_v27, %v46_v26 }
  0x23   :  { %v55_v32 = vmax.f32 %v51_v28, 0.0  ;;  %v56_v33 = vmax.f32 %v52_v29, 0.0  ;;  %v57_v34 = vmax.f32 %v53_v30, 0.0  ;;  %v58_v35 = vmax.f32 %v54_v31, 0.0 }
  0x25   :  { %59 = vst [vmem:[#allocation2] sm:$0xff] %v55_v32  ;;  %60 = vst [vmem:[#allocation2 + $0x8] sm:$0xff] %v56_v33 }
  0x26   :  { %61 = vst [vmem:[#allocation2 + $0x10] sm:$0xff] %v57_v34  ;;  %62 = vst [vmem:[#allocation2 + $0x18] sm:$0xff] %v58_v35 }
  0x27   :  { %95 = shalt.err (!%p92_p4)
}
  0x28   :  { %s96_s28 = scalar_lea.hbm %s167_s3, 512 }
  0x29   :  { %p97_p5 = scmp.ne.s32.totalorder %s167_s3, %s96_s28  ;;  %p100_p6 = scmp.lt.u32.totalorder %s96_s28, %s167_s3 }
  0x2b   :  { %p102_p7 = pnand %p100_p6, %p97_p5 }
  0x2d   :  { %105 = shalt.err (!%p102_p7)
}
  0x2e   :  { %s109_s6 = smov 128   ;;  %s110_s7 = smov 8  }
  0x2f   :  { %74 = dma.vmem_to_hbm [thread:$0]  %s69_s25, 512, %s167_s3, [#allocation3], %s109_s6, %s109_s6, %s110_s7  }
  0x30   :  { %106 = dma.done.wait [#allocation3], 512  }
  0x31   :  { %107 = vsyncadd [#allocation3], 4294966784 }
  0x32   :  { %78 = vsyncpa [#allocation3], 1 }

</bundles_post_ra>
